<compile_context>
chip_gen: v7x
topology: tpu7x:2x2x1
jax: 0.10.0
libtpu: 0.0.40
codegen_flags: <defaults>
</compile_context>

<pallas_src>
import functools
import math

import jax
import jax.numpy as jnp
from jax.experimental import pallas as pl
from jax.experimental.pallas import tpu as pltpu


# --------------------------------------------------------------------------
# helpers
# --------------------------------------------------------------------------
def _tile(n, pref, base):
    """Largest tile <= pref that divides n and is a multiple of base, else full n."""
    if n <= pref:
        return n
    t = (pref // base) * base
    while t >= base:
        if n % t == 0:
            return t
        t -= base
    return n


@functools.lru_cache(maxsize=None)
def _chip_budget():
    """(vmem_limit_bytes, row_tile_pref) derived from the physical VMEM size."""
    try:
        cap = int(pltpu.get_tpu_info().vmem_capacity_bytes)
    except Exception:
        cap = 0
    if cap >= 100 * 1024 * 1024:            # v5e / v6e: 128 MiB physical VMEM
        return 80 * 1024 * 1024, 512
    if cap > 0:                             # v7x: 64 MiB per TensorCore
        return 40 * 1024 * 1024, 256
    return 32 * 1024 * 1024, 256            # unknown: conservative


def _cparams(semantics):
    vmem, _ = _chip_budget()
    return pltpu.CompilerParams(dimension_semantics=semantics,
                                vmem_limit_bytes=vmem)


# --------------------------------------------------------------------------
# tiled linear:  y = x @ w + b     (x: (N, din), w: (din, dout) bf16)
# --------------------------------------------------------------------------
def _linear_kernel(x_ref, w_ref, b_ref, o_ref, acc_ref):
    k = pl.program_id(2)

    @pl.when(k == 0)
    def _():
        acc_ref[...] = jnp.zeros_like(acc_ref)

    acc_ref[...] += jnp.dot(x_ref[...].astype(jnp.bfloat16), w_ref[...],
                            preferred_element_type=jnp.float32)

    @pl.when(k == pl.num_programs(2) - 1)
    def _():
        o_ref[...] = (acc_ref[...] + b_ref[...]).astype(o_ref.dtype)


def linear(x, w, b, out_dtype=jnp.float32):
    N, din = x.shape
    dout = w.shape[1]
    _, tm_pref = _chip_budget()
    tm = _tile(N, tm_pref, 8)
    tn = _tile(dout, 256, 128)
    tk = _tile(din, 512, 128)
    grid = (N // tm, dout // tn, din // tk)
    return pl.pallas_call(
        _linear_kernel,
        out_shape=jax.ShapeDtypeStruct((N, dout), out_dtype),
        grid=grid,
        in_specs=[
            pl.BlockSpec((tm, tk), lambda i, j, k: (i, k)),
            pl.BlockSpec((tk, tn), lambda i, j, k: (k, j)),
            pl.BlockSpec((1, tn), lambda i, j, k: (0, j)),
        ],
        out_specs=pl.BlockSpec((tm, tn), lambda i, j, k: (i, j)),
        scratch_shapes=[pltpu.VMEM((tm, tn), jnp.float32)],
        compiler_params=_cparams(("parallel", "parallel", "arbitrary")),
    )(x, w, b.reshape(1, dout))


# --------------------------------------------------------------------------
# fused attention block: LN(x + out_proj(MHA(qkv_proj(x))))
# grid = (batch, query tile); K/V are computed for the full sequence per step.
# --------------------------------------------------------------------------
def _attn_block_kernel(xq_ref, xs_ref, wqkv_ref, bqkv_ref, wout_ref, bout_ref,
                       g_ref, be_ref, o_ref, *, nhead, scale):
    xq = xq_ref[0]                                   # (tq, d) bf16 — query rows
    xs = xs_ref[0]                                   # (S, d)  bf16 — full sequence
    tq, d = xq.shape
    dh = d // nhead

    wqkv = wqkv_ref[...]                             # (d, 3d) bf16
    bqkv = bqkv_ref[...]                             # (1, 3d) f32

    # projections (bf16 operands, f32 accumulation); cast to bf16 ONCE, outside the
    # per-head loop.
    q = (jnp.dot(xq, wqkv[:, 0:d], preferred_element_type=jnp.float32)
         + bqkv[:, 0:d]).astype(jnp.bfloat16)                        # (tq, d)
    k = (jnp.dot(xs, wqkv[:, d:2 * d], preferred_element_type=jnp.float32)
         + bqkv[:, d:2 * d]).astype(jnp.bfloat16)                    # (S, d)
    v = (jnp.dot(xs, wqkv[:, 2 * d:3 * d], preferred_element_type=jnp.float32)
         + bqkv[:, 2 * d:3 * d]).astype(jnp.bfloat16)                # (S, d)

    # per-head attention; contexts concatenated along lanes into one (tq, d) buffer
    ctx_parts = []
    for h in range(nhead):
        sl = slice(h * dh, (h + 1) * dh)
        # q . k^T without an explicit transpose: contract last dims of both.
        s = jax.lax.dot_general(q[:, sl], k[:, sl], (((1,), (1,)), ((), ())),
                                preferred_element_type=jnp.float32) * scale
        m = jnp.max(s, axis=-1, keepdims=True)
        p = jnp.exp(s - m)
        p = p * pl.reciprocal(jnp.sum(p, axis=-1, keepdims=True), approx=True)
        ctx_parts.append(jnp.dot(p.astype(jnp.bfloat16), v[:, sl],
                                 preferred_element_type=jnp.float32))
    ctx = jnp.concatenate(ctx_parts, axis=-1)                        # (tq, d) f32

    # single full-K out_proj matmul (K = d, not dh)
    attn = jnp.dot(ctx.astype(jnp.bfloat16), wout_ref[...],
                   preferred_element_type=jnp.float32) + bout_ref[...]

    # residual + LayerNorm (post-norm, f32 statistics, eps=1e-5)
    y = xq.astype(jnp.float32) + attn
    mu = jnp.mean(y, axis=-1, keepdims=True)
    yc = y - mu
    var = jnp.mean(yc * yc, axis=-1, keepdims=True)
    o_ref[0] = (yc * jax.lax.rsqrt(var + 1e-5) * g_ref[...]
                + be_ref[...]).astype(o_ref.dtype)


def attention_block(x, B, S, w_qkv, b_qkv, w_out, b_out, gamma, beta, nhead):
    d = x.shape[-1]
    dh = d // nhead
    scale = 1.0 / math.sqrt(dh)
    tq = _tile(S, 256, 8)
    xb = x.reshape(B, S, d)
    out = pl.pallas_call(
        functools.partial(_attn_block_kernel, nhead=nhead, scale=scale),
        out_shape=jax.ShapeDtypeStruct((B, S, d), jnp.bfloat16),
        grid=(B, S // tq),
        in_specs=[
            pl.BlockSpec((1, tq, d), lambda b, qi: (b, qi, 0)),   # query rows
            pl.BlockSpec((1, S, d), lambda b, qi: (b, 0, 0)),     # full sequence (K/V)
            pl.BlockSpec((d, 3 * d), lambda b, qi: (0, 0)),
            pl.BlockSpec((1, 3 * d), lambda b, qi: (0, 0)),
            pl.BlockSpec((d, d), lambda b, qi: (0, 0)),
            pl.BlockSpec((1, d), lambda b, qi: (0, 0)),
            pl.BlockSpec((1, d), lambda b, qi: (0, 0)),
            pl.BlockSpec((1, d), lambda b, qi: (0, 0)),
        ],
        out_specs=pl.BlockSpec((1, tq, d), lambda b, qi: (b, qi, 0)),
        compiler_params=_cparams(("parallel", "parallel")),
    )(xb, xb, w_qkv, b_qkv.reshape(1, 3 * d), w_out,
      b_out.reshape(1, d), gamma.reshape(1, d), beta.reshape(1, d))
    return out.reshape(B * S, d)


# --------------------------------------------------------------------------
# fused FFN block: LN(x + relu(x@W1+b1)@W2 + b2), K-gridded over dim_feedforward
# --------------------------------------------------------------------------
def _ffn_kernel(x_ref, w1_ref, b1_ref, w2_ref, b2_ref, g_ref, be_ref,
                o_ref, acc_ref):
    k = pl.program_id(1)

    @pl.when(k == 0)
    def _():
        acc_ref[...] = jnp.zeros_like(acc_ref)

    h = jnp.dot(x_ref[...], w1_ref[...],
                preferred_element_type=jnp.float32) + b1_ref[...]
    h = jnp.maximum(h, 0.0).astype(jnp.bfloat16)
    acc_ref[...] += jnp.dot(h, w2_ref[...], preferred_element_type=jnp.float32)

    @pl.when(k == pl.num_programs(1) - 1)
    def _():
        y = x_ref[...].astype(jnp.float32) + acc_ref[...] + b2_ref[...]
        mu = jnp.mean(y, axis=-1, keepdims=True)
        yc = y - mu
        var = jnp.mean(yc * yc, axis=-1, keepdims=True)
        o_ref[...] = (yc * jax.lax.rsqrt(var + 1e-5) * g_ref[...]
                      + be_ref[...]).astype(o_ref.dtype)


def ffn_block(x, w1, b1, w2, b2, gamma, beta):
    N, d = x.shape
    dff = w1.shape[1]
    _, tm_pref = _chip_budget()
    tm = _tile(N, tm_pref, 8)
    tk = _tile(dff, 512, 128)
    grid = (N // tm, dff // tk)
    return pl.pallas_call(
        _ffn_kernel,
        out_shape=jax.ShapeDtypeStruct((N, d), jnp.bfloat16),
        grid=grid,
        in_specs=[
            pl.BlockSpec((tm, d), lambda i, k: (i, 0)),
            pl.BlockSpec((d, tk), lambda i, k: (0, k)),
            pl.BlockSpec((1, tk), lambda i, k: (0, k)),
            pl.BlockSpec((tk, d), lambda i, k: (k, 0)),
            pl.BlockSpec((1, d), lambda i, k: (0, 0)),
            pl.BlockSpec((1, d), lambda i, k: (0, 0)),
            pl.BlockSpec((1, d), lambda i, k: (0, 0)),
        ],
        out_specs=pl.BlockSpec((tm, d), lambda i, k: (i, 0)),
        scratch_shapes=[pltpu.VMEM((tm, d), jnp.float32)],
        compiler_params=_cparams(("parallel", "arbitrary")),
    )(x, w1, b1.reshape(1, dff), w2, b2.reshape(1, d),
      gamma.reshape(1, d), beta.reshape(1, d))


# --------------------------------------------------------------------------
# Parameter construction (deterministic, synthetic).  Weight matrices stored in
# bf16 (MXU operands); biases / LN params / accumulation stay f32.
# --------------------------------------------------------------------------
def init_params(key, input_size, d_model, nhead, num_layers, dim_feedforward):
    def dense(k, fan_in, fan_out, scale=0.05):
        kw, kb = jax.random.split(k)
        w = scale * jax.random.normal(kw, (fan_in, fan_out), jnp.float32)
        b = scale * jax.random.normal(kb, (fan_out,), jnp.float32)
        return w.astype(jnp.bfloat16), b

    keys = jax.random.split(key, 2 + num_layers)
    w_in, b_in = dense(keys[0], input_size, d_model)
    w_o, b_o = dense(keys[1], d_model, input_size)

    layers = []
    for l in range(num_layers):
        lk = jax.random.split(keys[2 + l], 4)
        w_qkv, b_qkv = dense(lk[0], d_model, 3 * d_model)
        w_out, b_out = dense(lk[1], d_model, d_model)
        w1, b1 = dense(lk[2], d_model, dim_feedforward)
        w2, b2 = dense(lk[3], dim_feedforward, d_model)
        layers.append(dict(
            w_qkv=w_qkv, b_qkv=b_qkv, w_out=w_out, b_out=b_out,
            w1=w1, b1=b1, w2=w2, b2=b2,
            g1=jnp.ones((d_model,), jnp.float32),
            be1=jnp.zeros((d_model,), jnp.float32),
            g2=jnp.ones((d_model,), jnp.float32),
            be2=jnp.zeros((d_model,), jnp.float32)))

    return dict(d_model=d_model, nhead=nhead,
                w_in=w_in, b_in=b_in, w_o=w_o, b_o=b_o, layers=layers)


def _pad_cols(w, b, mult=128):
    """Zero-pad the out-dim of (w, b) to a multiple of `mult` for lane-dense stores."""
    dout = w.shape[1]
    pad = (-dout) % mult
    if pad == 0:
        return w, b, dout
    return (jnp.pad(w, ((0, 0), (0, pad))),
            jnp.pad(b, ((0, pad),)), dout)


# --------------------------------------------------------------------------
# Forward pass
# --------------------------------------------------------------------------
def transformer_encoder_forward(src, params):
    S, B, in_size = src.shape
    d = params["d_model"]
    H = params["nhead"]

    # single layout change to (B, S, *); per-layer kernels then run transpose-free.
    x = jnp.transpose(src, (1, 0, 2)).reshape(B * S, in_size)

    # input_linear -> bf16 inter-layer activations
    x = linear(x, params["w_in"], params["b_in"], out_dtype=jnp.bfloat16)

    for layer in params["layers"]:
        # fused QKV proj + MHA + single out_proj + residual + LayerNorm
        x = attention_block(x, B, S, layer["w_qkv"], layer["b_qkv"],
                            layer["w_out"], layer["b_out"],
                            layer["g1"], layer["be1"], H)
        # fused W1 + ReLU -> W2 (K-gridded) + residual + LayerNorm
        x = ffn_block(x, layer["w1"], layer["b1"], layer["w2"], layer["b2"],
                      layer["g2"], layer["be2"])

    # output_linear: out-dim zero-padded to 128 for lane-dense stores, sliced outside.
    w_o, b_o, dout = _pad_cols(params["w_o"], params["b_o"])
    out = linear(x, w_o, b_o, out_dtype=jnp.float32)[:, :dout]        # (B*S, in_size)
    return jnp.transpose(out.reshape(B, S, dout), (1, 0, 2))          # (S, B, in_size)


# --------------------------------------------------------------------------
if __name__ == "__main__":
    S, B = 8, 2
    input_size = 16
    d_model = 32
    nhead = 4
    num_layers = 2
    dim_feedforward = 64

    key = jax.random.PRNGKey(0)
    k_src, k_par = jax.random.split(key)
    src = jax.random.normal(k_src, (S, B, input_size), jnp.float32)
    params = init_params(k_par, input_size, d_model, nhead, num_layers,
                         dim_feedforward)

    out = transformer_encoder_forward(src, params)
    out = jax.block_until_ready(out)
    assert out.shape == (S, B, input_size)
    assert bool(jnp.all(jnp.isfinite(out)))
    print("KERNEL_OK")
</pallas_src>

<mosaic_0001>
module attributes {stable_mosaic.version = 11 : i64} {
  func.func @_linear_kernel(%arg0: i32, %arg1: i32, %arg2: i32, %arg3: memref<16x16xf32, #tpu.memory_space<vmem>>, %arg4: memref<16x32xbf16, #tpu.memory_space<vmem>>, %arg5: memref<1x32xf32, #tpu.memory_space<vmem>>, %arg6: memref<16x32xbf16, #tpu.memory_space<vmem>>, %arg7: memref<16x32xf32, #tpu.memory_space<vmem>>) attributes {dimension_semantics = [#tpu.dimension_semantics<parallel>, #tpu.dimension_semantics<parallel>, #tpu.dimension_semantics<arbitrary>], iteration_bounds = array<i64: 1, 1, 1>, scalar_prefetch = 0 : i64, scratch_operands = 1 : i64, tpu.core_type = #tpu.core_type<tc>, window_params = [{transform_indices = @transform_0, window_bounds = array<i64: 16, 16>}, {transform_indices = @transform_1, window_bounds = array<i64: 16, 32>}, {transform_indices = @transform_2, window_bounds = array<i64: 1, 32>}, {transform_indices = @transform_3, window_bounds = array<i64: 16, 32>}]} {
    %c0_i32 = arith.constant 0 : i32
    %0 = arith.cmpi eq, %arg2, %c0_i32 : i32
    %1 = arith.extui %0 : i1 to i32
    %c0_i32_0 = arith.constant 0 : i32
    %2 = arith.cmpi ne, %1, %c0_i32_0 : i32
    scf.if %2 {
      %cst_10 = arith.constant 0.000000e+00 : f32
      %13 = vector.broadcast %cst_10 : f32 to vector<16x32xf32>
      %c0_11 = arith.constant 0 : index
      %c0_12 = arith.constant 0 : index
      %14 = vector.load %arg7[%c0_11, %c0_12] : memref<16x32xf32, #tpu.memory_space<vmem>>, vector<16x32xf32>
      tpu.vector_store %arg7[%c0_11, %c0_12], %13 {strides = array<i32>} : memref<16x32xf32, #tpu.memory_space<vmem>>, vector<16x32xf32>,
    } else {
    }
    %c0 = arith.constant 0 : index
    %c0_1 = arith.constant 0 : index
    %3 = vector.load %arg7[%c0, %c0_1] : memref<16x32xf32, #tpu.memory_space<vmem>>, vector<16x32xf32>
    %c0_2 = arith.constant 0 : index
    %c0_3 = arith.constant 0 : index
    %4 = vector.load %arg3[%c0_2, %c0_3] : memref<16x16xf32, #tpu.memory_space<vmem>>, vector<16x16xf32>
    %5 = arith.truncf %4 : vector<16x16xf32> to vector<16x16xbf16>
    %c0_4 = arith.constant 0 : index
    %c0_5 = arith.constant 0 : index
    %6 = vector.load %arg4[%c0_4, %c0_5] : memref<16x32xbf16, #tpu.memory_space<vmem>>, vector<16x32xbf16>
    %cst = arith.constant dense<0.000000e+00> : vector<16x32xf32>
    %7 = tpu.matmul %5, %6, %cst {dimension_numbers = #tpu.dot_dimension_numbers<[1], [0], [0], [1], [0, 0, 1, 1], [], []>} : vector<16x16xbf16>, vector<16x32xbf16>, vector<16x32xf32> -> vector<16x32xf32>
    %8 = arith.addf %3, %7 : vector<16x32xf32>
    %c0_6 = arith.constant 0 : index
    %c0_7 = arith.constant 0 : index
    %9 = vector.load %arg7[%c0_6, %c0_7] : memref<16x32xf32, #tpu.memory_space<vmem>>, vector<16x32xf32>
    tpu.vector_store %arg7[%c0_6, %c0_7], %8 {strides = array<i32>} : memref<16x32xf32, #tpu.memory_space<vmem>>, vector<16x32xf32>,
    %c0_i32_8 = arith.constant 0 : i32
    %10 = arith.cmpi eq, %arg2, %c0_i32_8 : i32
    %11 = arith.extui %10 : i1 to i32
    %c0_i32_9 = arith.constant 0 : i32
    %12 = arith.cmpi ne, %11, %c0_i32_9 : i32
    scf.if %12 {
      %c0_10 = arith.constant 0 : index
      %c0_11 = arith.constant 0 : index
      %13 = vector.load %arg7[%c0_10, %c0_11] : memref<16x32xf32, #tpu.memory_space<vmem>>, vector<16x32xf32>
      %c0_12 = arith.constant 0 : index
      %c0_13 = arith.constant 0 : index
      %14 = vector.load %arg5[%c0_12, %c0_13] : memref<1x32xf32, #tpu.memory_space<vmem>>, vector<1x32xf32>
      %15 = vector.broadcast %14 : vector<1x32xf32> to vector<16x32xf32>
      %16 = arith.addf %13, %15 : vector<16x32xf32>
      %17 = arith.truncf %16 : vector<16x32xf32> to vector<16x32xbf16>
      %c0_14 = arith.constant 0 : index
      %c0_15 = arith.constant 0 : index
      %18 = vector.load %arg6[%c0_14, %c0_15] : memref<16x32xbf16, #tpu.memory_space<vmem>>, vector<16x32xbf16>
      tpu.vector_store %arg6[%c0_14, %c0_15], %17 {strides = array<i32>} : memref<16x32xbf16, #tpu.memory_space<vmem>>, vector<16x32xbf16>,
    } else {
    }
    return
  }
  func.func @transform_0(%arg0: i32, %arg1: i32, %arg2: i32) -> (i32, i32) {
    %c0_i32 = arith.constant 0 : i32
    return %arg0, %arg2 : i32, i32
  }
  func.func @transform_1(%arg0: i32, %arg1: i32, %arg2: i32) -> (i32, i32) {
    %c0_i32 = arith.constant 0 : i32
    return %arg2, %arg1 : i32, i32
  }
  func.func @transform_2(%arg0: i32, %arg1: i32, %arg2: i32) -> (i32, i32) {
    %c0_i32 = arith.constant 0 : i32
    %c0_i32_0 = arith.constant 0 : i32
    return %c0_i32, %arg1 : i32, i32
  }
  func.func @transform_3(%arg0: i32, %arg1: i32, %arg2: i32) -> (i32, i32) {
    %c0_i32 = arith.constant 0 : i32
    return %arg0, %arg1 : i32, i32
  }
}

</mosaic_0001>

<bundles_post_ra>
// kernel: tpu_custom_call.1
= control target key start
LH: loop header
LB: loop body
LE: loop exit
PB: predicated region body
PF: predicated region fallthrough
CT: control target
= control target key end

     0   :  { %8 = vsyncpa [#allocation4], 0  ;;  %s332_s0 = inlined_call_operand.hbm [shape: f32[16,16], index: 0, kind: input, shape index: {}]   ;;  %s333_s1 = inlined_call_operand.hbm [shape: bf16[16,32], index: 1, kind: input, shape index: {}]   ;;  %s334_s2 = inlined_call_operand.vmem [shape: f32[1,32], index: 2, kind: input, shape index: {}]   ;;  %s335_s3 = inlined_call_operand.hbm [shape: bf16[16,32], index: 3, kind: output, shape index: {}]  }
   0x1   :  { %9 = vsyncpa [#allocation7], 0 }
   0x2   :  { %10 = vsyncpa [#allocation5], 0  ;;  %s254_s12 = smov [#allocation3]   ;;  %s182_s16 = scalar_lea.hbm %s332_s0, 256 }
   0x3   :  { %s16_s13 = sshll.u32 %s254_s12, 4  ;;  %p183_p0 = scmp.ne.s32.totalorder %s332_s0, %s182_s16  ;;  %s17_s13 = int_to_ptr.vmem [resolvable:$true] %s16_s13 }
   0x4   :  { %p186_p1 = scmp.lt.u32.totalorder %s182_s16, %s332_s0 }
   0x6   :  { %p188_p2 = pnand %p186_p1, %p183_p0 }
   0x8   :  { %191 = shalt.err (!%p188_p2)
}
   0x9   :  { %s192_s21 = scalar_lea.vmem %s17_s13, 256  ;;  %p197_p4 = scmp.lt.s32.totalorder %s17_s13, %s17_s13 }
   0xa   :  { %p193_p3 = scmp.ne.s32.totalorder %s17_s13, %s192_s21  ;;  %p198_p5 = scmp.lt.s32.totalorder %s192_s21, %s192_s21 }
   0xc   :  { %p199_p6 = por %p198_p5, %p197_p4 }
   0xe   :  { %p200_p7 = pnand %p199_p6, %p193_p3 }
  0x10   :  { %203 = shalt.err (!%p200_p7)
}
  0x11   :  { %s255_s22 = smov 128   ;;  %s256_s23 = smov 8  }
  0x12   :  { %22 = dma.hbm_to_vmem [thread:$0]  %s332_s0, 256, %s17_s13, [#allocation4], %s255_s22, %s255_s22, %s256_s23  }
  0x13   :  { %s257_s26 = smov [#allocation6]   ;;  %s204_s30 = scalar_lea.hbm %s333_s1, 128 }
  0x14   :  { %s28_s27 = sshll.u32 %s257_s26, 4  ;;  %p205_p8 = scmp.ne.s32.totalorder %s333_s1, %s204_s30  ;;  %s29_s27 = int_to_ptr.vmem [resolvable:$true] %s28_s27 }
  0x15   :  { %p208_p9 = scmp.lt.u32.totalorder %s204_s30, %s333_s1 }
  0x17   :  { %p210_p10 = pnand %p208_p9, %p205_p8 }
  0x19   :  { %213 = shalt.err (!%p210_p10)
}
  0x1a   :  { %s214_s8 = scalar_lea.vmem %s29_s27, 128  ;;  %p219_p12 = scmp.lt.s32.totalorder %s29_s27, %s29_s27 }
  0x1b   :  { %p215_p11 = scmp.ne.s32.totalorder %s29_s27, %s214_s8  ;;  %p220_p13 = scmp.lt.s32.totalorder %s214_s8, %s214_s8 }
  0x1d   :  { %p221_p0 = por %p220_p13, %p219_p12 }
  0x1f   :  { %p222_p1 = pnand %p221_p0, %p215_p11 }
  0x21   :  { %225 = shalt.err (!%p222_p1)
}
  0x22   :  { %s258_s0 = smov 64   ;;  %s259_s9 = smov 4  }
  0x23   :  { %34 = dma.hbm_to_vmem [thread:$0]  %s333_s1, 128, %s29_s27, [#allocation7], %s258_s0, %s258_s0, %s259_s9  }
  0x24   :  { %248 = dma.done.wait [#allocation4], 256  }
  0x25   :  { %249 = vsyncadd [#allocation4], 4294967040 }
  0x26   :  { %250 = dma.done.wait [#allocation7], 128  }
  0x27   :  { %251 = vsyncadd [#allocation7], 4294967168  ;;  %vm48_vm0 = vcmask 261120   ;;  %v260_v0 = vmov 0.0   ;;  %vm261_vm1 = vmmov 0   ;;  %v181_v1 = vld [vmem:[#allocation6] sm:$0xff]  }
  0x28   :  { %49 = vst.msk [vmem:[#allocation2] sm:$0xff] %vm48_vm0, %v260_v0  ;;  %50 = vst.msk [vmem:[#allocation2 + $0x8] sm:$0xff] %vm48_vm0, %v260_v0  ;;  %166 = vmatprep.subr.bf16.mxu0 %v260_v0  ;;  %168 = vmatprep.mubr.msk.bf16.mxu0 %vm261_vm1, %v260_v0  ;;  %v53_v2 = vld [vmem:[#allocation3] sm:$0xff]  ;;  %v54_v3 = vld [vmem:[#allocation3 + $0x8] sm:$0xff]  ;;  %vm64_vm2 = vcmask 130048   ;;  %vm136_vm3 = vcmask 257024  }
  0x29   :  { %167 = vmatpush3.bf16.msra.mxu0 %v181_v1  ;;  %v55_v4 = vpack.c.bf16 %v54_v3, %v53_v2  ;;  %v159_v13 = vld [vmem:[%s334_s2] ss:$0 sm:$0xff]  ;;  %s262_s13 = smov [#allocation8]  }
  0x2a   :  { %s144_s14 = sshll.u32 %s262_s13, 4  ;;  %s145_s14 = int_to_ptr.vmem [resolvable:$true] %s144_s14 }
  0x2b   :  { %s226_s15 = scalar_lea.vmem %s145_s14, 128  ;;  %p231_p3 = scmp.lt.s32.totalorder %s145_s14, %s145_s14 }
  0x2c   :  { %169 = vmatmul.mubr.msk.bf16.vlgmr.msra.gmra.mrb[0].mxu0 %vm64_vm2, %v55_v4  ;;  %p227_p2 = scmp.ne.s32.totalorder %s145_s14, %s226_s15  ;;  %p232_p4 = scmp.lt.s32.totalorder %s226_s15, %s226_s15 }
  0x2e   :  { %p233_p5 = por %p232_p4, %p231_p3 }
  0x2f   :  { %v51_v5 = vld [vmem:[#allocation2] sm:$0xff]  ;;  %v52_v7 = vld [vmem:[#allocation2 + $0x8] sm:$0xff] }
  0x30   :  { %p234_p6 = pnand %p233_p5, %p227_p2 }
  0xff   :  { %v102_v6 = vpop.f32.mrb[0].mxu0 }
 0x100   :  { %v109_v8 = vadd.f32 %v102_v6, %v51_v5  ;;  %v170_v9 = vpop.f32.mrb[1].mxu0 }
 0x101   :  { %v105_v10 = vpop.f32.mrb[2].mxu0 }
 0x102   :  { %112 = vst.msk [vmem:[#allocation2] sm:$0xff] %vm48_vm0, %v109_v8  ;;  %v110_v11 = vadd.f32 %v105_v10, %v52_v7  ;;  %v171_v12 = vpop.f32.mrb[3].mxu0 }
 0x104   :  { %113 = vst.msk [vmem:[#allocation2 + $0x8] sm:$0xff] %vm48_vm0, %v110_v11 }
 0x109   :  { %v117_v14 = vld [vmem:[#allocation2] sm:$0xff] }
 0x10a   :  { %v126_v15 = vadd.f32 %v159_v13, %v117_v14 }
 0x10b   :  { %v118_v16 = vld [vmem:[#allocation2 + $0x8] sm:$0xff] }
 0x10c   :  { %v127_v17 = vadd.f32 %v159_v13, %v118_v16  ;;  %v162_v18 = vpack.c.bf16 %v126_v15, %v126_v15 }
 0x10e   :  { %v163_v19 = vpack.c.bf16 %v127_v17, %v127_v17  ;;  %137 = vst.msk [vmem:[#allocation8] sm:$0xf] %vm136_vm3, %v162_v18 }
 0x110   :  { %138 = vst.msk [vmem:[#allocation8 + $0x4] sm:$0xf] %vm136_vm3, %v163_v19 }
 0x111   :  { %237 = shalt.err (!%p234_p6)
}
 0x112   :  { %s238_s17 = scalar_lea.hbm %s335_s3, 128 }
 0x113   :  { %p239_p7 = scmp.ne.s32.totalorder %s335_s3, %s238_s17  ;;  %p242_p8 = scmp.lt.u32.totalorder %s238_s17, %s335_s3 }
 0x115   :  { %p244_p9 = pnand %p242_p8, %p239_p7 }
 0x117   :  { %247 = shalt.err (!%p244_p9)
}
 0x118   :  { %150 = dma.vmem_to_hbm [thread:$0]  %s145_s14, 128, %s335_s3, [#allocation5], %s258_s0, %s258_s0, %s259_s9  }
 0x119   :  { %252 = dma.done.wait [#allocation5], 128  }
 0x11a   :  { %253 = vsyncadd [#allocation5], 4294967168 }
 0x11b   :  { %154 = vsyncpa [#allocation4], 1 }
 0x11c   :  { %155 = vsyncpa [#allocation7], 1 }
 0x11d   :  { %156 = vsyncpa [#allocation5], 1 }

</bundles_post_ra>
